<compile_context>
chip_gen: v6e
topology: v6e:2x2x1
jax: 0.10.0
libtpu: 0.0.40
codegen_flags: <defaults>
</compile_context>

<pallas_src>
import functools

import jax
import jax.numpy as jnp
from jax.experimental import pallas as pl
from jax.experimental.pallas import tpu as pltpu


def dqn_kernel(x_ref, w1_ref, b1_ref, w2_ref, b2_ref, w3_ref, b3_ref,
               w4_ref, b4_ref, o_ref):
    # Four fused Linear layers: bf16 operands on the MXU, f32 accumulation,
    # bias + ReLU on the VPU, re-cast to bf16 between layers.
    x = x_ref[...].astype(jnp.bfloat16)          # in-kernel cast (VPU filler)
    h = jnp.dot(x, w1_ref[...], preferred_element_type=jnp.float32)
    h = jnp.maximum(h + b1_ref[...], 0.0).astype(jnp.bfloat16)
    h = jnp.dot(h, w2_ref[...], preferred_element_type=jnp.float32)
    h = jnp.maximum(h + b2_ref[...], 0.0).astype(jnp.bfloat16)
    h = jnp.dot(h, w3_ref[...], preferred_element_type=jnp.float32)
    h = jnp.maximum(h + b3_ref[...], 0.0).astype(jnp.bfloat16)
    h = jnp.dot(h, w4_ref[...], preferred_element_type=jnp.float32)
    # Unpadded (block_b, n_actions) store; no wrapper-side slice needed.
    o_ref[...] = (h + b4_ref[...]).astype(o_ref.dtype)


def _num_tensorcores():
    """Best-effort detection of a multi-TensorCore chip (v7x). Defaults to 1."""
    try:
        kind = jax.devices()[0].device_kind.lower()
        if "v7" in kind:
            return 2
    except Exception:
        pass
    return 1


def _round_up(n, m):
    return ((n + m - 1) // m) * m


def _pick_block_b(batch, n_cores):
    """Batch tile size.

    Single-TC chips (v5e/v6e): one full-extent tile up to 1024 rows (grid is a
    serial loop there, splitting is pure per-step overhead). Multi-TC (v7x):
    2-way split once each half has >=128 rows so both TensorCores get work.
    Very large batches: MXU-aligned 512-row blocks.
    """
    if n_cores >= 2 and batch >= 256:
        half = -(-batch // 2)                       # ceil(batch / 2)
        half = _round_up(half, 256) if half >= 256 else _round_up(half, 128)
        return min(512, half)
    if batch <= 1024:
        return batch                                # full-extent block is always legal
    return 512


def prepare_dqn_params(params):
    """One-time prep: cast weights to bf16 for the MXU (do NOT call per step)."""
    w1, b1, w2, b2, w3, b3, w4, b4 = params
    return (w1.astype(jnp.bfloat16), b1,
            w2.astype(jnp.bfloat16), b2,
            w3.astype(jnp.bfloat16), b3,
            w4.astype(jnp.bfloat16), b4)


@functools.partial(jax.jit, static_argnames=("block_b",))
def dqn_forward(x, prep_params, block_b=None):
    """x: [B, n_observations] float32 -> [B, n_actions] float32.

    `prep_params` must come from `prepare_dqn_params` (bf16 weights, f32 biases).
    """
    w1, b1, w2, b2, w3, b3, w4, b4 = prep_params
    B, n_obs = x.shape
    n_actions = w4.shape[1]

    if block_b is None:
        block_b = _pick_block_b(B, _num_tensorcores())

    grid = (pl.cdiv(B, block_b),)
    # Resident weights/biases: constant index_map, fetched once.
    # TODO(synk): pipeline_mode=pl.Buffered(1) on these once verified on the
    # target jax version (minor VMEM/descriptor win only).
    full = lambda arr: pl.BlockSpec(arr.shape, lambda i: (0, 0))

    out = pl.pallas_call(
        dqn_kernel,
        out_shape=jax.ShapeDtypeStruct((B, n_actions), jnp.float32),
        grid_spec=pltpu.PrefetchScalarGridSpec(
            num_scalar_prefetch=0,
            grid=grid,
            in_specs=[
                pl.BlockSpec((block_b, n_obs), lambda i: (i, 0)),   # x tile (f32)
                full(w1), full(b1),                                 # resident weights
                full(w2), full(b2),
                full(w3), full(b3),
                full(w4), full(b4),
            ],
            out_specs=pl.BlockSpec((block_b, n_actions), lambda i: (i, 0)),
        ),
        compiler_params=pltpu.CompilerParams(
            dimension_semantics=("parallel",)),
    )(x, w1, b1, w2, b2, w3, b3, w4, b4)

    return out


def init_dqn_params(key, n_observations, n_actions):
    """Deterministic init mimicking PyTorch nn.Linear default
    (U[-1/sqrt(fan_in), 1/sqrt(fan_in)]). Weights stored as [in, out], f32."""
    dims = [(n_observations, 256), (256, 256), (256, 128), (128, n_actions)]
    params = []
    for (fan_in, fan_out) in dims:
        key, kw, kb = jax.random.split(key, 3)
        bound = 1.0 / jnp.sqrt(jnp.float32(fan_in))
        w = jax.random.uniform(kw, (fan_in, fan_out), jnp.float32, -bound, bound)
        b = jax.random.uniform(kb, (1, fan_out), jnp.float32, -bound, bound)
        params.extend([w, b])
    return tuple(params)


def dqn_reference(x, params):
    w1, b1, w2, b2, w3, b3, w4, b4 = params
    h = jnp.maximum(x @ w1 + b1, 0.0)
    h = jnp.maximum(h @ w2 + b2, 0.0)
    h = jnp.maximum(h @ w3 + b3, 0.0)
    return h @ w4 + b4


if __name__ == "__main__":
    key = jax.random.PRNGKey(0)
    n_observations, n_actions = 32, 8

    params_f32 = init_dqn_params(key, n_observations, n_actions)
    prep = prepare_dqn_params(params_f32)    # one-time weight prep

    # Small smoke test (single tile, block_b = B).
    key, kx = jax.random.split(key)
    x_small = jax.random.normal(kx, (8, n_observations), jnp.float32)
    out_small = jax.block_until_ready(dqn_forward(x_small, prep))
    ref_small = dqn_reference(x_small, params_f32)
    assert out_small.shape == (8, n_actions)
    assert jnp.allclose(out_small, ref_small, atol=5e-2, rtol=5e-2), \
        "mismatch vs reference (small batch)"

    # Larger batch: single tile on v5e/v6e, 2-way split on v7x.
    key, kx2 = jax.random.split(key)
    x_big = jax.random.normal(kx2, (260, n_observations), jnp.float32)
    out_big = jax.block_until_ready(dqn_forward(x_big, prep))
    ref_big = dqn_reference(x_big, params_f32)
    assert out_big.shape == (260, n_actions)
    assert jnp.allclose(out_big, ref_big, atol=5e-2, rtol=5e-2), \
        "mismatch vs reference (large batch)"

    print("KERNEL_OK")
</pallas_src>

<mosaic_0001>
module attributes {stable_mosaic.version = 11 : i64} {
  func.func @dqn_kernel(%arg0: i32, %arg1: memref<8x32xf32, #tpu.memory_space<vmem>>, %arg2: memref<32x256xbf16, #tpu.memory_space<vmem>>, %arg3: memref<1x256xf32, #tpu.memory_space<vmem>>, %arg4: memref<256x256xbf16, #tpu.memory_space<vmem>>, %arg5: memref<1x256xf32, #tpu.memory_space<vmem>>, %arg6: memref<256x128xbf16, #tpu.memory_space<vmem>>, %arg7: memref<1x128xf32, #tpu.memory_space<vmem>>, %arg8: memref<128x8xbf16, #tpu.memory_space<vmem>>, %arg9: memref<1x8xf32, #tpu.memory_space<vmem>>, %arg10: memref<8x8xf32, #tpu.memory_space<vmem>>) attributes {dimension_semantics = [#tpu.dimension_semantics<parallel>], iteration_bounds = array<i64: 1>, scalar_prefetch = 0 : i64, scratch_operands = 0 : i64, tpu.core_type = #tpu.core_type<tc>, window_params = [{transform_indices = @transform_0, window_bounds = array<i64: 8, 32>}, {pipeline_mode = #tpu.pipeline_mode<synchronous>, transform_indices = @transform_1, window_bounds = array<i64: 32, 256>}, {pipeline_mode = #tpu.pipeline_mode<synchronous>, transform_indices = @transform_2, window_bounds = array<i64: 1, 256>}, {pipeline_mode = #tpu.pipeline_mode<synchronous>, transform_indices = @transform_3, window_bounds = array<i64: 256, 256>}, {pipeline_mode = #tpu.pipeline_mode<synchronous>, transform_indices = @transform_4, window_bounds = array<i64: 1, 256>}, {pipeline_mode = #tpu.pipeline_mode<synchronous>, transform_indices = @transform_5, window_bounds = array<i64: 256, 128>}, {pipeline_mode = #tpu.pipeline_mode<synchronous>, transform_indices = @transform_6, window_bounds = array<i64: 1, 128>}, {pipeline_mode = #tpu.pipeline_mode<synchronous>, transform_indices = @transform_7, window_bounds = array<i64: 128, 8>}, {pipeline_mode = #tpu.pipeline_mode<synchronous>, transform_indices = @transform_8, window_bounds = array<i64: 1, 8>}, {transform_indices = @transform_9, window_bounds = array<i64: 8, 8>}]} {
    %c0 = arith.constant 0 : index
    %c0_0 = arith.constant 0 : index
    %0 = vector.load %arg1[%c0, %c0_0] : memref<8x32xf32, #tpu.memory_space<vmem>>, vector<8x32xf32>
    %1 = arith.truncf %0 : vector<8x32xf32> to vector<8x32xbf16>
    %c0_1 = arith.constant 0 : index
    %c0_2 = arith.constant 0 : index
    %2 = vector.load %arg2[%c0_1, %c0_2] : memref<32x256xbf16, #tpu.memory_space<vmem>>, vector<32x256xbf16>
    %cst = arith.constant dense<0.000000e+00> : vector<8x256xf32>
    %3 = tpu.matmul %1, %2, %cst {dimension_numbers = #tpu.dot_dimension_numbers<[1], [0], [0], [1], [0, 0, 1, 1], [], []>} : vector<8x32xbf16>, vector<32x256xbf16>, vector<8x256xf32> -> vector<8x256xf32>
    %c0_3 = arith.constant 0 : index
    %c0_4 = arith.constant 0 : index
    %4 = vector.load %arg3[%c0_3, %c0_4] : memref<1x256xf32, #tpu.memory_space<vmem>>, vector<1x256xf32>
    %5 = vector.broadcast %4 : vector<1x256xf32> to vector<8x256xf32>
    %6 = arith.addf %3, %5 : vector<8x256xf32>
    %cst_5 = arith.constant 0.000000e+00 : f32
    %7 = vector.broadcast %cst_5 : f32 to vector<8x256xf32>
    %8 = arith.maximumf %6, %7 : vector<8x256xf32>
    %9 = arith.truncf %8 : vector<8x256xf32> to vector<8x256xbf16>
    %c0_6 = arith.constant 0 : index
    %c0_7 = arith.constant 0 : index
    %10 = vector.load %arg4[%c0_6, %c0_7] : memref<256x256xbf16, #tpu.memory_space<vmem>>, vector<256x256xbf16>
    %cst_8 = arith.constant dense<0.000000e+00> : vector<8x256xf32>
    %11 = tpu.matmul %9, %10, %cst_8 {dimension_numbers = #tpu.dot_dimension_numbers<[1], [0], [0], [1], [0, 0, 1, 1], [], []>} : vector<8x256xbf16>, vector<256x256xbf16>, vector<8x256xf32> -> vector<8x256xf32>
    %c0_9 = arith.constant 0 : index
    %c0_10 = arith.constant 0 : index
    %12 = vector.load %arg5[%c0_9, %c0_10] : memref<1x256xf32, #tpu.memory_space<vmem>>, vector<1x256xf32>
    %13 = vector.broadcast %12 : vector<1x256xf32> to vector<8x256xf32>
    %14 = arith.addf %11, %13 : vector<8x256xf32>
    %cst_11 = arith.constant 0.000000e+00 : f32
    %15 = vector.broadcast %cst_11 : f32 to vector<8x256xf32>
    %16 = arith.maximumf %14, %15 : vector<8x256xf32>
    %17 = arith.truncf %16 : vector<8x256xf32> to vector<8x256xbf16>
    %c0_12 = arith.constant 0 : index
    %c0_13 = arith.constant 0 : index
    %18 = vector.load %arg6[%c0_12, %c0_13] : memref<256x128xbf16, #tpu.memory_space<vmem>>, vector<256x128xbf16>
    %cst_14 = arith.constant dense<0.000000e+00> : vector<8x128xf32>
    %19 = tpu.matmul %17, %18, %cst_14 {dimension_numbers = #tpu.dot_dimension_numbers<[1], [0], [0], [1], [0, 0, 1, 1], [], []>} : vector<8x256xbf16>, vector<256x128xbf16>, vector<8x128xf32> -> vector<8x128xf32>
    %c0_15 = arith.constant 0 : index
    %c0_16 = arith.constant 0 : index
    %20 = vector.load %arg7[%c0_15, %c0_16] : memref<1x128xf32, #tpu.memory_space<vmem>>, vector<1x128xf32>
    %21 = vector.broadcast %20 : vector<1x128xf32> to vector<8x128xf32>
    %22 = arith.addf %19, %21 : vector<8x128xf32>
    %cst_17 = arith.constant 0.000000e+00 : f32
    %23 = vector.broadcast %cst_17 : f32 to vector<8x128xf32>
    %24 = arith.maximumf %22, %23 : vector<8x128xf32>
    %25 = arith.truncf %24 : vector<8x128xf32> to vector<8x128xbf16>
    %c0_18 = arith.constant 0 : index
    %c0_19 = arith.constant 0 : index
    %26 = vector.load %arg8[%c0_18, %c0_19] : memref<128x8xbf16, #tpu.memory_space<vmem>>, vector<128x8xbf16>
    %cst_20 = arith.constant dense<0.000000e+00> : vector<8x8xf32>
    %27 = tpu.matmul %25, %26, %cst_20 {dimension_numbers = #tpu.dot_dimension_numbers<[1], [0], [0], [1], [0, 0, 1, 1], [], []>} : vector<8x128xbf16>, vector<128x8xbf16>, vector<8x8xf32> -> vector<8x8xf32>
    %c0_21 = arith.constant 0 : index
    %c0_22 = arith.constant 0 : index
    %28 = vector.load %arg9[%c0_21, %c0_22] : memref<1x8xf32, #tpu.memory_space<vmem>>, vector<1x8xf32>
    %29 = vector.broadcast %28 : vector<1x8xf32> to vector<8x8xf32>
    %30 = arith.addf %27, %29 : vector<8x8xf32>
    %c0_23 = arith.constant 0 : index
    %c0_24 = arith.constant 0 : index
    %31 = vector.load %arg10[%c0_23, %c0_24] : memref<8x8xf32, #tpu.memory_space<vmem>>, vector<8x8xf32>
    tpu.vector_store %arg10[%c0_23, %c0_24], %30 {strides = array<i32>} : memref<8x8xf32, #tpu.memory_space<vmem>>, vector<8x8xf32>,
    return
  }
  func.func @transform_0(%arg0: i32) -> (i32, i32) {
    %c0_i32 = arith.constant 0 : i32
    %c0_i32_0 = arith.constant 0 : i32
    return %arg0, %c0_i32 : i32, i32
  }
  func.func @transform_1(%arg0: i32) -> (i32, i32) {
    %c0_i32 = arith.constant 0 : i32
    %c0_i32_0 = arith.constant 0 : i32
    %c0_i32_1 = arith.constant 0 : i32
    return %c0_i32, %c0_i32_0 : i32, i32
  }
  func.func @transform_2(%arg0: i32) -> (i32, i32) {
    %c0_i32 = arith.constant 0 : i32
    %c0_i32_0 = arith.constant 0 : i32
    %c0_i32_1 = arith.constant 0 : i32
    return %c0_i32, %c0_i32_0 : i32, i32
  }
  func.func @transform_3(%arg0: i32) -> (i32, i32) {
    %c0_i32 = arith.constant 0 : i32
    %c0_i32_0 = arith.constant 0 : i32
    %c0_i32_1 = arith.constant 0 : i32
    return %c0_i32, %c0_i32_0 : i32, i32
  }
  func.func @transform_4(%arg0: i32) -> (i32, i32) {
    %c0_i32 = arith.constant 0 : i32
    %c0_i32_0 = arith.constant 0 : i32
    %c0_i32_1 = arith.constant 0 : i32
    return %c0_i32, %c0_i32_0 : i32, i32
  }
  func.func @transform_5(%arg0: i32) -> (i32, i32) {
    %c0_i32 = arith.constant 0 : i32
    %c0_i32_0 = arith.constant 0 : i32
    %c0_i32_1 = arith.constant 0 : i32
    return %c0_i32, %c0_i32_0 : i32, i32
  }
  func.func @transform_6(%arg0: i32) -> (i32, i32) {
    %c0_i32 = arith.constant 0 : i32
    %c0_i32_0 = arith.constant 0 : i32
    %c0_i32_1 = arith.constant 0 : i32
    return %c0_i32, %c0_i32_0 : i32, i32
  }
  func.func @transform_7(%arg0: i32) -> (i32, i32) {
    %c0_i32 = arith.constant 0 : i32
    %c0_i32_0 = arith.constant 0 : i32
    %c0_i32_1 = arith.constant 0 : i32
    return %c0_i32, %c0_i32_0 : i32, i32
  }
  func.func @transform_8(%arg0: i32) -> (i32, i32) {
    %c0_i32 = arith.constant 0 : i32
    %c0_i32_0 = arith.constant 0 : i32
    %c0_i32_1 = arith.constant 0 : i32
    return %c0_i32, %c0_i32_0 : i32, i32
  }
  func.func @transform_9(%arg0: i32) -> (i32, i32) {
    %c0_i32 = arith.constant 0 : i32
    %c0_i32_0 = arith.constant 0 : i32
    return %arg0, %c0_i32 : i32, i32
  }
}

</mosaic_0001>

<bundles_post_ra>
// kernel: dqn_forward.1
= control target key start
LH: loop header
LB: loop body
LE: loop exit
PB: predicated region body
PF: predicated region fallthrough
CT: control target
= control target key end

     0   :  { %14 = vsyncpa [#allocation3], 0  ;;  %s1092_s0 = inlined_call_operand.vmem [shape: f32[8,32], index: 0, kind: input, shape index: {}]   ;;  %s1093_s1 = inlined_call_operand.vmem [shape: bf16[32,256], index: 1, kind: input, shape index: {}]   ;;  %s1094_s2 = inlined_call_operand.vmem [shape: f32[1,256], index: 2, kind: input, shape index: {}]   ;;  %s1095_s3 = inlined_call_operand.hbm [shape: bf16[256,256], index: 3, kind: input, shape index: {}]   ;;  %s1096_s4 = inlined_call_operand.vmem [shape: f32[1,256], index: 4, kind: input, shape index: {}]   ;;  %s1097_s5 = inlined_call_operand.hbm [shape: bf16[256,128], index: 5, kind: input, shape index: {}]   ;;  %s1098_s6 = inlined_call_operand.vmem [shape: f32[1,128], index: 6, kind: input, shape index: {}]   ;;  %s1099_s7 = inlined_call_operand.vmem [shape: bf16[128,8], index: 7, kind: input, shape index: {}]   ;;  %s1100_s8 = inlined_call_operand.vmem [shape: f32[1,8], index: 8, kind: input, shape index: {}]   ;;  %s1101_s9 = inlined_call_operand.hbm [shape: f32[8,8], index: 9, kind: output, shape index: {}]  }
   0x1   :  { %15 = vsyncpa [#allocation6], 0 }
   0x2   :  { %16 = vsyncpa [#allocation4], 0  ;;  %s972_s30 = smov [#allocation2]  }
   0x3   :  { %s28_s10 = sshll.u32 %s972_s30, 4  ;;  %s29_s10 = int_to_ptr.vmem [resolvable:$true] %s28_s10 }
   0x4   :  { %s914_s11 = scalar_lea.vmem %s29_s10, 4096  ;;  %p919_p1 = scmp.lt.s32.totalorder %s29_s10, %s29_s10 }
   0x5   :  { %p915_p0 = scmp.ne.s32.totalorder %s29_s10, %s914_s11  ;;  %p920_p2 = scmp.lt.s32.totalorder %s914_s11, %s914_s11 }
   0x7   :  { %p921_p3 = por %p920_p2, %p919_p1 }
   0x9   :  { %p922_p4 = pnand %p921_p3, %p915_p0 }
   0xb   :  { %925 = shalt.err (!%p922_p4)
}
   0xc   :  { %s973_s12 = smov 128   ;;  %s974_s13 = smov 8  }
   0xd   :  { %34 = dma.hbm_to_vmem [thread:$0]  %s1095_s3, 4096, %s29_s10, [#allocation3], %s973_s12, %s973_s12, %s974_s13  }
   0xe   :  { %s975_s16 = smov [#allocation5]  }
   0xf   :  { %s42_s17 = sshll.u32 %s975_s16, 4  ;;  %s43_s17 = int_to_ptr.vmem [resolvable:$true] %s42_s17 }
  0x10   :  { %s934_s18 = scalar_lea.vmem %s43_s17, 2048  ;;  %p939_p6 = scmp.lt.s32.totalorder %s43_s17, %s43_s17 }
  0x11   :  { %p935_p5 = scmp.ne.s32.totalorder %s43_s17, %s934_s18  ;;  %p940_p7 = scmp.lt.s32.totalorder %s934_s18, %s934_s18 }
  0x13   :  { %p941_p8 = por %p940_p7, %p939_p6 }
  0x15   :  { %p942_p9 = pnand %p941_p8, %p935_p5 }
  0x17   :  { %945 = shalt.err (!%p942_p9)
}
  0x18   :  { %s976_s19 = smov 64   ;;  %s977_s20 = smov 4  }
  0x19   :  { %48 = dma.hbm_to_vmem [thread:$0]  %s1097_s5, 2048, %s43_s17, [#allocation6], %s976_s19, %s976_s19, %s977_s20  }
  0x1a   :  { %966 = dma.done.wait [#allocation3], 4096  }
  0x1b   :  { %967 = vsyncadd [#allocation3], 4294963200 }
  0x1c   :  { %968 = dma.done.wait [#allocation6], 2048  }
  0x1d   :  { %969 = vsyncadd [#allocation6], 4294965248  ;;  %v978_v0 = vmov 0   ;;  %v828_v1 = vld [vmem:[%s1093_s1 + $0x14] ss:$8 sps:$4 sm:$0xff]   ;;  %v62_v5 = vld [vmem:[%s1092_s0] sm:$0xff]  ;;  %v70_v51 = vlaneseq }
  0x1e   :  { %136 = vmatprep.mubr.bf16.mxu0 %v978_v0  ;;  %v830_v2 = vld [vmem:[%s1093_s1 + $0x10] ss:$8 sps:$4 sm:$0xff]   ;;  %116 = vmatprep.subr.bf16.mxu0 %v828_v1  ;;  %v831_v3 = vld [vmem:[%s1093_s1 + $0x4] ss:$8 sps:$4 sm:$0xff]   ;;  %v833_v4 = vld [vmem:[%s1093_s1] ss:$8 sps:$4 sm:$0xff]   ;;  %v63_v9 = vpack.c.bf16 %v62_v5, %v62_v5 }
  0x1f   :  { %117 = vmatpush1.bf16.msra.mxu0 %v830_v2  ;;  %v834_v6 = vld [vmem:[#allocation2 + $0x74] ss:$8 sps:$4 sm:$0xff]   ;;  %v836_v7 = vld [vmem:[#allocation2 + $0x70] ss:$8 sps:$4 sm:$0xff]   ;;  %v837_v8 = vld [vmem:[#allocation2 + $0x64] ss:$8 sps:$4 sm:$0xff]  }
  0x20   :  { %118 = vmatprep.subr.bf16.mxu0 %v831_v3  ;;  %353 = vmatprep.subr.bf16.mxu1 %v834_v6  ;;  %v839_v10 = vld [vmem:[#allocation2 + $0x60] ss:$8 sps:$4 sm:$0xff]   ;;  %vm100_vm0 = vcmask 261120   ;;  %v840_v11 = vld [vmem:[#allocation2 + $0x54] ss:$8 sps:$4 sm:$0xff]   ;;  %v71_v52 = vshrl.u32 %v70_v51, 7 }
  0x21   :  { %354 = vmatpush1.bf16.msra.mxu1 %v836_v7  ;;  %v842_v12 = vld [vmem:[#allocation2 + $0x50] ss:$8 sps:$4 sm:$0xff]   ;;  %v843_v13 = vld [vmem:[#allocation2 + $0x44] ss:$8 sps:$4 sm:$0xff]   ;;  %v845_v14 = vld [vmem:[#allocation2 + $0x40] ss:$8 sps:$4 sm:$0xff]  }
  0x22   :  { %355 = vmatprep.subr.bf16.mxu1 %v837_v8  ;;  %v846_v15 = vld [vmem:[#allocation2 + $0x34] ss:$8 sps:$4 sm:$0xff]   ;;  %v848_v16 = vld [vmem:[#allocation2 + $0x30] ss:$8 sps:$4 sm:$0xff]   ;;  %v849_v17 = vld [vmem:[#allocation2 + $0x24] ss:$8 sps:$4 sm:$0xff]  }
  0x23   :  { %119 = vmatpush1.bf16.msra.mxu0 %v833_v4  ;;  %v851_v18 = vld [vmem:[#allocation2 + $0x20] ss:$8 sps:$4 sm:$0xff]   ;;  %v852_v19 = vld [vmem:[#allocation2 + $0x14] ss:$8 sps:$4 sm:$0xff]   ;;  %v854_v20 = vld [vmem:[#allocation2 + $0x10] ss:$8 sps:$4 sm:$0xff]  }
  0x24   :  { %v855_v21 = vld [vmem:[#allocation2 + $0x4] ss:$8 sps:$4 sm:$0xff]   ;;  %v857_v22 = vld [vmem:[#allocation2] ss:$8 sps:$4 sm:$0xff]   ;;  %v858_v23 = vld [vmem:[#allocation2 + $0xf4] ss:$8 sps:$4 sm:$0xff]  }
  0x25   :  { %356 = vmatpush1.bf16.msra.mxu1 %v839_v10  ;;  %v860_v24 = vld [vmem:[#allocation2 + $0xf0] ss:$8 sps:$4 sm:$0xff]   ;;  %v861_v25 = vld [vmem:[#allocation2 + $0xe4] ss:$8 sps:$4 sm:$0xff]   ;;  %v863_v26 = vld [vmem:[#allocation2 + $0xe0] ss:$8 sps:$4 sm:$0xff]  }
  0x26   :  { %708 = vmatmul.mubr.msk.bf16.vlgmr.msra.gmra.mxu0 %vm100_vm0, %v63_v9  ;;  %357 = vmatprep.subr.bf16.mxu1 %v840_v11  ;;  %v864_v27 = vld [vmem:[#allocation2 + $0xd4] ss:$8 sps:$4 sm:$0xff]   ;;  %v866_v28 = vld [vmem:[#allocation2 + $0xd0] ss:$8 sps:$4 sm:$0xff]   ;;  %v867_v29 = vld [vmem:[#allocation2 + $0xc4] ss:$8 sps:$4 sm:$0xff]  }
  0x27   :  { %v869_v30 = vld [vmem:[#allocation2 + $0xc0] ss:$8 sps:$4 sm:$0xff]   ;;  %v870_v31 = vld [vmem:[#allocation2 + $0xb4] ss:$8 sps:$4 sm:$0xff]   ;;  %v872_v32 = vld [vmem:[#allocation2 + $0xb0] ss:$8 sps:$4 sm:$0xff]  }
  0x28   :  { %v873_v33 = vld [vmem:[#allocation2 + $0xa4] ss:$8 sps:$4 sm:$0xff]   ;;  %v875_v34 = vld [vmem:[#allocation2 + $0xa0] ss:$8 sps:$4 sm:$0xff]   ;;  %v876_v35 = vld [vmem:[#allocation2 + $0x94] ss:$8 sps:$4 sm:$0xff]  }
  0x29   :  { %358 = vmatpush1.bf16.msra.mxu1 %v842_v12  ;;  %v878_v36 = vld [vmem:[#allocation2 + $0x90] ss:$8 sps:$4 sm:$0xff]   ;;  %v879_v37 = vld [vmem:[#allocation2 + $0x84] ss:$8 sps:$4 sm:$0xff]   ;;  %v881_v38 = vld [vmem:[#allocation2 + $0x80] ss:$8 sps:$4 sm:$0xff]  }
  0x2a   :  { %359 = vmatprep.subr.bf16.mxu1 %v843_v13  ;;  %v882_v39 = vld [vmem:[#allocation5 + $0x78] sm:$0xff]   ;;  %v884_v41 = vld [vmem:[#allocation5 + $0x70] sm:$0xff]   ;;  %v886_v43 = vld [vmem:[#allocation5 + $0x68] sm:$0xff]   ;;  %v72_v53 = vsub.s32 0, %v71_v52  ;;  %v76_v55 = vsub.s32 1, %v71_v52  ;;  %v979_v8 = vmov 0.0  }
  0x2b   :  { %v883_v40 = vld [vmem:[#allocation5 + $0x38] sm:$0xff]   ;;  %767 = vmatprep.subr.bf16.mxu0 %v882_v39  ;;  %v885_v42 = vld [vmem:[#allocation5 + $0x30] sm:$0xff]   ;;  %v887_v44 = vld [vmem:[#allocation5 + $0x28] sm:$0xff]   ;;  %vm980_vm1 = vmmov 0   ;;  %vm686_vm2 = vcmask 64512  }
  0x2c   :  { %768 = vmatpush3.bf16.msra.mxu0 %v883_v40  ;;  %v888_v45 = vld [vmem:[#allocation5 + $0x60] sm:$0xff]   ;;  %v890_v47 = vld [vmem:[#allocation5 + $0x58] sm:$0xff]   ;;  %v892_v49 = vld [vmem:[#allocation5 + $0x50] sm:$0xff]  }
  0x2d   :  { %360 = vmatpush1.bf16.msra.mxu1 %v845_v14  ;;  %769 = vmatprep.subr.bf16.mxu0 %v884_v41  ;;  %v889_v46 = vld [vmem:[#allocation5 + $0x20] sm:$0xff]   ;;  %v891_v48 = vld [vmem:[#allocation5 + $0x18] sm:$0xff]   ;;  %v893_v50 = vld [vmem:[#allocation5 + $0x10] sm:$0xff]  }
  0x2e   :  { %361 = vmatprep.subr.bf16.mxu1 %v846_v15  ;;  %v68_v54 = vld [vmem:[%s1094_s2] sm:$0x3]  ;;  %v894_v4 = vld [vmem:[#allocation5 + $0x48] sm:$0xff]  }
  0x2f   :  { %v73_v56 = vrot.slane %v68_v54, %v72_v53  ;;  %v77_v57 = vrot.slane %v68_v54, %v76_v55  ;;  %v895_v5 = vld [vmem:[#allocation5 + $0x8] sm:$0xff]   ;;  %v896_v6 = vld [vmem:[#allocation5 + $0x40] sm:$0xff]  }
  0x30   :  { %770 = vmatpush3.bf16.msra.mxu0 %v885_v42  ;;  %v897_v7 = vld [vmem:[#allocation5] sm:$0xff]  }
  0x31   :  { %362 = vmatpush1.bf16.msra.mxu1 %v848_v16  ;;  %771 = vmatprep.subr.bf16.mxu0 %v886_v43  ;;  %v181_v9 = vld [vmem:[%s1096_s4] sm:$0x3] }
  0x32   :  { %363 = vmatprep.subr.bf16.mxu1 %v849_v17  ;;  %v186_v10 = vrot.slane %v181_v9, %v72_v53  ;;  %v190_v11 = vrot.slane %v181_v9, %v76_v55  ;;  %v758_v39 = vld [vmem:[%s1100_s8] ss:$0 sm:$0xff] }
  0x34   :  { %772 = vmatpush3.bf16.msra.mxu0 %v887_v44 }
  0x35   :  { %364 = vmatpush1.bf16.msra.mxu1 %v851_v18  ;;  %773 = vmatprep.subr.bf16.mxu0 %v888_v45 }
  0x36   :  { %365 = vmatprep.subr.bf16.mxu1 %v852_v19 }
  0x38   :  { %774 = vmatpush3.bf16.msra.mxu0 %v889_v46 }
  0x39   :  { %366 = vmatpush1.bf16.msra.mxu1 %v854_v20  ;;  %775 = vmatprep.subr.bf16.mxu0 %v890_v47 }
  0x3a   :  { %367 = vmatprep.subr.bf16.mxu1 %v855_v21  ;;  %v898_v21 = vld [vmem:[%s1099_s7 + $0x38] sm:$0xff]  }
  0x3c   :  { %776 = vmatpush3.bf16.msra.mxu0 %v891_v48 }
  0x3d   :  { %368 = vmatpush1.bf16.msra.mxu1 %v857_v22  ;;  %777 = vmatprep.subr.bf16.mxu0 %v892_v49 }
  0x3e   :  { %369 = vmatprep.subr.bf16.mxu1 %v858_v23  ;;  %v899_v23 = vld [vmem:[%s1099_s7 + $0x30] sm:$0xff]  }
  0x40   :  { %778 = vmatpush3.bf16.msra.mxu0 %v893_v50 }
  0x41   :  { %370 = vmatpush2.bf16.msra.mxu1 %v860_v24  ;;  %779 = vmatprep.subr.bf16.mxu0 %v894_v4  ;;  %v900_v24 = vld [vmem:[%s1099_s7 + $0x28] sm:$0xff]  }
  0x42   :  { %371 = vmatprep.subr.bf16.mxu1 %v861_v25  ;;  %v901_v25 = vld [vmem:[%s1099_s7 + $0x20] sm:$0xff]  }
  0x44   :  { %780 = vmatpush3.bf16.msra.mxu0 %v895_v5 }
  0x45   :  { %372 = vmatpush2.bf16.msra.mxu1 %v863_v26  ;;  %781 = vmatprep.subr.bf16.mxu0 %v896_v6  ;;  %v902_v26 = vld [vmem:[%s1099_s7 + $0x18] sm:$0xff]  }
  0x46   :  { %373 = vmatprep.subr.bf16.mxu1 %v864_v27  ;;  %v903_v27 = vld [vmem:[%s1099_s7 + $0x10] sm:$0xff]  }
  0x48   :  { %782 = vmatpush3.bf16.msra.mxu0 %v897_v7 }
  0x49   :  { %374 = vmatpush2.bf16.msra.mxu1 %v866_v28  ;;  %798 = vmatprep.subr.bf16.mxu0 %v979_v8  ;;  %v904_v28 = vld [vmem:[%s1099_s7 + $0x8] sm:$0xff]  }
  0x4a   :  { %375 = vmatprep.subr.bf16.mxu1 %v867_v29  ;;  %v905_v29 = vld [vmem:[%s1099_s7] sm:$0xff]   ;;  %s981_s7 = smov [#allocation7]  }
  0x4b   :  { %s694_s28 = sshll.u32 %s981_s7, 4  ;;  %s695_s28 = int_to_ptr.vmem [resolvable:$true] %s694_s28 }
  0x4c   :  { %p951_p11 = scmp.lt.s32.totalorder %s695_s28, %s695_s28 }
  0x4d   :  { %376 = vmatpush2.bf16.msra.mxu1 %v869_v30 }
  0x4e   :  { %377 = vmatprep.subr.bf16.mxu1 %v870_v31  ;;  %v741_v31 = vld [vmem:[%s1098_s6] ss:$0 sm:$0xff]  ;;  %s946_s6 = scalar_lea.vmem %s695_s28, 128 }
  0x4f   :  { %p947_p10 = scmp.ne.s32.totalorder %s695_s28, %s946_s6  ;;  %p952_p12 = scmp.lt.s32.totalorder %s946_s6, %s946_s6 }
  0x51   :  { %378 = vmatpush2.bf16.msra.mxu1 %v872_v32  ;;  %p953_p13 = por %p952_p12, %p951_p11 }
  0x52   :  { %379 = vmatprep.subr.bf16.mxu1 %v873_v33 }
  0x53   :  { %p954_p0 = pnand %p953_p13, %p947_p10 }
  0x55   :  { %380 = vmatpush2.bf16.msra.mxu1 %v875_v34 }
  0x56   :  { %381 = vmatprep.subr.bf16.mxu1 %v876_v35 }
  0x59   :  { %382 = vmatpush2.bf16.msra.mxu1 %v878_v36 }
  0x5a   :  { %383 = vmatprep.subr.bf16.mxu1 %v879_v37 }
  0x5d   :  { %384 = vmatpush2.bf16.msra.mxu1 %v881_v38 }
  0xe6   :  { %v138_v58 = vpop.f32.mrf.mxu0 }
  0xe7   :  { %v139_v59 = vadd.f32 %v138_v58, %v73_v56 }
  0xe8   :  { %v140_v60 = vpop.f32.mrf.mxu0 }
  0xe9   :  { %v141_v61 = vadd.f32 %v140_v60, %v77_v57  ;;  %v145_v62 = vmax.f32 %v139_v59, 0.0 }
  0xea   :  { %v142_v63 = vpop.f32.mrf.mxu0 }
  0xeb   :  { %v146_v0 = vmax.f32 %v141_v61, 0.0  ;;  %v147_v3 = vpack.c.bf16 %v145_v62, %v145_v62 }
  0xec   :  { %v143_v1 = vpop.f32.mrf.mxu0 }
  0xed   :  { %v148_v2 = vpack.c.bf16 %v146_v0, %v146_v0 }
  0xef   :  { %385 = vmatprep.mubr.bf16.mxu1 %v148_v2 }
  0xf0   :  { %386 = vmatmul.mubr.bf16.vlgmr.msra.gmra.mxu1 %v147_v3 }
 0x1b0   :  { %v387_v12 = vpop.f32.mrf.mxu1 }
 0x1b1   :  { %v388_v13 = vadd.f32 %v387_v12, %v186_v10 }
 0x1b2   :  { %v389_v14 = vpop.f32.mrf.mxu1 }
 0x1b3   :  { %v390_v15 = vadd.f32 %v389_v14, %v190_v11  ;;  %v394_v16 = vmax.f32 %v388_v13, 0.0 }
 0x1b4   :  { %v391_v17 = vpop.f32.mrf.mxu1 }
 0x1b5   :  { %v395_v18 = vmax.f32 %v390_v15, 0.0  ;;  %v396_v22 = vpack.c.bf16 %v394_v16, %v394_v16 }
 0x1b6   :  { %v392_v19 = vpop.f32.mrf.mxu1 }
 0x1b7   :  { %v397_v20 = vpack.c.bf16 %v395_v18, %v395_v18 }
 0x1b9   :  { %565 = vmatprep.mubr.bf16.mxu0 %v397_v20 }
 0x1ba   :  { %566 = vmatmul.mubr.bf16.vlgmr.msra.gmra.mxu0 %v396_v22 }
 0x1bb   :  { %799 = vmatpush3.bf16.msra.mxu0 %v898_v21  ;;  %814 = vmatprep.mubr.msk.bf16.mxu0 %vm980_vm1, %v979_v8 }
 0x1bc   :  { %800 = vmatprep.subr.bf16.mxu0 %v979_v8 }
 0x1bf   :  { %801 = vmatpush3.bf16.msra.mxu0 %v899_v23 }
 0x1c0   :  { %802 = vmatprep.subr.bf16.mxu0 %v979_v8 }
 0x1c3   :  { %803 = vmatpush3.bf16.msra.mxu0 %v900_v24 }
 0x1c4   :  { %804 = vmatprep.subr.bf16.mxu0 %v979_v8 }
 0x1c7   :  { %805 = vmatpush3.bf16.msra.mxu0 %v901_v25 }
 0x1c8   :  { %806 = vmatprep.subr.bf16.mxu0 %v979_v8 }
 0x1cb   :  { %807 = vmatpush3.bf16.msra.mxu0 %v902_v26 }
 0x1cc   :  { %808 = vmatprep.subr.bf16.mxu0 %v979_v8 }
 0x1cf   :  { %809 = vmatpush3.bf16.msra.mxu0 %v903_v27 }
 0x1d0   :  { %810 = vmatprep.subr.bf16.mxu0 %v979_v8 }
 0x1d3   :  { %811 = vmatpush3.bf16.msra.mxu0 %v904_v28 }
 0x1d4   :  { %812 = vmatprep.subr.bf16.mxu0 %v979_v8 }
 0x1d7   :  { %813 = vmatpush3.bf16.msra.mxu0 %v905_v29 }
 0x27a   :  { %v783_v30 = vpop.f32.mrf.mxu0 }
 0x27c   :  { %v784_v32 = vpop.f32.mrf.mxu0 }
 0x27d   :  { %v785_v33 = vadd.f32 %v784_v32, %v783_v30 }
 0x27e   :  { %v786_v34 = vpop.f32.mrf.mxu0 }
 0x27f   :  { %v568_v35 = vadd.f32 %v785_v33, %v741_v31 }
 0x280   :  { %v787_v36 = vpop.f32.mrf.mxu0 }
 0x281   :  { %v573_v37 = vmax.f32 %v568_v35, 0.0 }
 0x283   :  { %v574_v38 = vpack.c.bf16 %v573_v37, %v573_v37 }
 0x285   :  { %815 = vmatmul.mubr.bf16.vlgmr.msra.gmra.mxu0 %v574_v38 }
 0x345   :  { %v680_v40 = vpop.f32.mrf.mxu0 }
 0x346   :  { %v681_v41 = vadd.f32 %v758_v39, %v680_v40 }
 0x347   :  { %v816_v42 = vpop.f32.mrf.mxu0 }
 0x348   :  { %687 = vst.msk [vmem:[#allocation7] sm:$0xff] %vm686_vm2, %v681_v41 }
 0x349   :  { %v683_v43 = vpop.f32.mrf.mxu0 }
 0x34a   :  { %957 = shalt.err (!%p954_p0)
}
 0x34b   :  { %697 = dma.vmem_to_hbm [thread:$0]  %s695_s28, 128, %s1101_s9, [#allocation4]   ;;  %v817_v44 = vpop.f32.mrf.mxu0 }
 0x34c   :  { %970 = dma.done.wait [#allocation4], 128  }
 0x34d   :  { %971 = vsyncadd [#allocation4], 4294967168 }
 0x34e   :  { %701 = vsyncpa [#allocation3], 1 }
 0x34f   :  { %702 = vsyncpa [#allocation6], 1 }
 0x350   :  { %703 = vsyncpa [#allocation4], 1 }

</bundles_post_ra>
